<compile_context>
chip_gen: v5e
topology: v5e:2x2
jax: 0.10.0
libtpu: 0.0.40
codegen_flags: <defaults>
</compile_context>

<pallas_src>
import jax
import jax.numpy as jnp
from jax.experimental import pallas as pl
from jax.experimental.pallas import tpu as pltpu


LANE = 128     # vreg lane width: last dim of each block padded to a multiple
SUBLANE = 8    # f32 sublane width: batch tile kept a multiple of this


def _round_up(x: int, m: int) -> int:
    return ((x + m - 1) // m) * m


def mlp_kernel(x_ref, w1_ref, b1_ref, w2_ref, b2_ref, w3_ref, b3_ref, o_ref):
    """Fused fc1 -> tanh -> fc2 -> tanh -> fc3 for one batch tile.

    Matmul inputs are bf16 (MXU-native), accumulation is f32; the bias add and
    tanh nonlinearities run on the f32 accumulator output.
    """
    x = x_ref[...]                                                   # (bt, nin_p) bf16
    h1 = jnp.dot(x, w1_ref[...], preferred_element_type=jnp.float32) + b1_ref[...]
    h1 = jnp.tanh(h1).astype(w2_ref.dtype)                           # bf16 for the MXU
    h2 = jnp.dot(h1, w2_ref[...], preferred_element_type=jnp.float32) + b2_ref[...]
    h2 = jnp.tanh(h2).astype(w3_ref.dtype)
    out = jnp.dot(h2, w3_ref[...], preferred_element_type=jnp.float32) + b3_ref[...]
    o_ref[...] = out.astype(o_ref.dtype)


def mlp_forward(x, w1, b1, w2, b2, w3, b3, *, batch_tile=None,
                compute_dtype=jnp.bfloat16):
    """x: (B, nin); w*: (in, out) pre-transposed; b*: (out,) or (1, out)."""
    B, nin = x.shape
    nh1 = w1.shape[1]
    nh2 = w2.shape[1]
    nout = w3.shape[1]
    out_dtype = x.dtype

    # ---- lane-pad the feature dims to multiples of 128 (zero padding is exact:
    #      padded x columns are 0, padded weight rows are 0, padded biases are 0,
    #      so padded hidden lanes are tanh(0)=0 and contribute nothing downstream).
    nin_p = _round_up(nin, LANE)
    nh1_p = _round_up(nh1, LANE)
    nh2_p = _round_up(nh2, LANE)
    nout_p = _round_up(nout, LANE)

    # ---- batch tiling: pipeline-friendly tile, batch padded to a tile multiple.
    if batch_tile is None:
        batch_tile = 512 if B >= 512 else _round_up(B, SUBLANE)
    batch_tile = max(SUBLANE, _round_up(batch_tile, SUBLANE))
    B_p = _round_up(B, batch_tile)
    grid = (B_p // batch_tile,)

    def pad2(a, rows, cols):
        a = a.reshape(a.shape[0] if a.ndim == 2 else 1, -1)
        return jnp.pad(a, ((0, rows - a.shape[0]), (0, cols - a.shape[1])))

    x_p = pad2(x, B_p, nin_p).astype(compute_dtype)
    w1_p = pad2(w1, nin_p, nh1_p).astype(compute_dtype)
    w2_p = pad2(w2, nh1_p, nh2_p).astype(compute_dtype)
    w3_p = pad2(w3, nh2_p, nout_p).astype(compute_dtype)
    b1_p = pad2(b1, 1, nh1_p).astype(jnp.float32)
    b2_p = pad2(b2, 1, nh2_p).astype(jnp.float32)
    b3_p = pad2(b3, 1, nout_p).astype(jnp.float32)

    # ---- cost estimate for the XLA scheduler around the custom call.
    itemsize = lambda a: jnp.dtype(a.dtype).itemsize
    flops = 2 * B_p * (nin_p * nh1_p + nh1_p * nh2_p + nh2_p * nout_p)
    transcendentals = B_p * (nh1_p + nh2_p)
    bytes_accessed = (
        x_p.size * itemsize(x_p)
        + w1_p.size * itemsize(w1_p) + w2_p.size * itemsize(w2_p)
        + w3_p.size * itemsize(w3_p)
        + (b1_p.size + b2_p.size + b3_p.size) * 4
        + B_p * nout_p * jnp.dtype(out_dtype).itemsize
    )
    cost = pl.CostEstimate(flops=flops, transcendentals=transcendentals,
                           bytes_accessed=bytes_accessed)

    # ---- VMEM budget hint: resident (double-buffered) weights/biases +
    #      double-buffered activation tiles + f32 intermediates, with 2x slack.
    #      Capped at 64 MiB so it never exceeds v7x physical VMEM.
    resident = 2 * ((w1_p.size + w2_p.size + w3_p.size) * itemsize(w1_p)
                    + (b1_p.size + b2_p.size + b3_p.size) * 4)
    act = 2 * batch_tile * (nin_p * itemsize(x_p)
                            + nout_p * jnp.dtype(out_dtype).itemsize)
    inter = batch_tile * (nh1_p + nh2_p + nout_p) * 4
    vmem_limit = int(min(max(2 * (resident + act + inter), 32 * 1024 * 1024),
                         64 * 1024 * 1024))

    # x / out tiled over the batch axis; weights & biases fully resident
    # (constant index_map -> fetched once, reused every grid step).
    in_specs = [
        pl.BlockSpec((batch_tile, nin_p), lambda i: (i, 0)),   # x
        pl.BlockSpec((nin_p, nh1_p), lambda i: (0, 0)),        # w1
        pl.BlockSpec((1, nh1_p), lambda i: (0, 0)),            # b1
        pl.BlockSpec((nh1_p, nh2_p), lambda i: (0, 0)),        # w2
        pl.BlockSpec((1, nh2_p), lambda i: (0, 0)),            # b2
        pl.BlockSpec((nh2_p, nout_p), lambda i: (0, 0)),       # w3
        pl.BlockSpec((1, nout_p), lambda i: (0, 0)),           # b3
    ]
    out_specs = pl.BlockSpec((batch_tile, nout_p), lambda i: (i, 0))

    out_padded = pl.pallas_call(
        mlp_kernel,
        out_shape=jax.ShapeDtypeStruct((B_p, nout_p), out_dtype),
        grid=grid,
        in_specs=in_specs,
        out_specs=out_specs,
        cost_estimate=cost,
        compiler_params=pltpu.CompilerParams(
            dimension_semantics=("parallel",),
            vmem_limit_bytes=vmem_limit,
        ),
    )(x_p, w1_p, b1_p, w2_p, b2_p, w3_p, b3_p)

    # Slice the padded batch/output lanes back off.
    return out_padded[:B, :nout]


def mlp_reference(x, w1, b1, w2, b2, w3, b3):
    h1 = jnp.tanh(x @ w1 + b1.reshape(1, -1))
    h2 = jnp.tanh(h1 @ w2 + b2.reshape(1, -1))
    return h2 @ w3 + b3.reshape(1, -1)


def init_linear(key, fan_in, fan_out, dtype=jnp.float32):
    # Deterministic init mimicking torch.nn.Linear (uniform +/- 1/sqrt(fan_in)).
    kw, kb = jax.random.split(key)
    bound = 1.0 / jnp.sqrt(fan_in)
    # PyTorch stores weight as (out, in); we pre-transpose to (in, out).
    w = jax.random.uniform(kw, (fan_in, fan_out), dtype, -bound, bound)
    b = jax.random.uniform(kb, (fan_out,), dtype, -bound, bound)
    return w, b


if __name__ == "__main__":
    # Small shapes implied by MLP(nin, nh1, nh2, nout). B=30 is deliberately
    # ragged and batch_tile=8 gives a multi-step grid to exercise the pipeline.
    B, nin, nh1, nh2, nout = 30, 32, 64, 64, 16

    key = jax.random.PRNGKey(0)
    kx, k1, k2, k3 = jax.random.split(key, 4)

    x = jax.random.normal(kx, (B, nin), jnp.float32)
    w1, b1 = init_linear(k1, nin, nh1)
    w2, b2 = init_linear(k2, nh1, nh2)
    w3, b3 = init_linear(k3, nh2, nout)

    out = mlp_forward(x, w1, b1, w2, b2, w3, b3, batch_tile=8)
    out = jax.block_until_ready(out)

    ref = mlp_reference(x, w1, b1, w2, b2, w3, b3)
    assert out.shape == (B, nout), f"bad shape {out.shape}"
    # bf16 matmul inputs with f32 accumulation -> ~1e-2 relative accuracy.
    assert jnp.allclose(out, ref, atol=3e-2, rtol=3e-2), (
        f"mismatch vs reference, max abs err={float(jnp.max(jnp.abs(out - ref)))}"
    )

    print("KERNEL_OK")
</pallas_src>

<mosaic_0001>
module attributes {stable_mosaic.version = 11 : i64} {
  func.func @mlp_kernel(%arg0: i32, %arg1: memref<8x128xbf16, #tpu.memory_space<vmem>>, %arg2: memref<128x128xbf16, #tpu.memory_space<vmem>>, %arg3: memref<1x128xf32, #tpu.memory_space<vmem>>, %arg4: memref<128x128xbf16, #tpu.memory_space<vmem>>, %arg5: memref<1x128xf32, #tpu.memory_space<vmem>>, %arg6: memref<128x128xbf16, #tpu.memory_space<vmem>>, %arg7: memref<1x128xf32, #tpu.memory_space<vmem>>, %arg8: memref<8x128xf32, #tpu.memory_space<vmem>>) attributes {dimension_semantics = [#tpu.dimension_semantics<parallel>], iteration_bounds = array<i64: 4>, scalar_prefetch = 0 : i64, scratch_operands = 0 : i64, tpu.core_type = #tpu.core_type<tc>, window_params = [{transform_indices = @transform_0, window_bounds = array<i64: 8, 128>}, {pipeline_mode = #tpu.pipeline_mode<synchronous>, transform_indices = @transform_1, window_bounds = array<i64: 128, 128>}, {pipeline_mode = #tpu.pipeline_mode<synchronous>, transform_indices = @transform_2, window_bounds = array<i64: 1, 128>}, {pipeline_mode = #tpu.pipeline_mode<synchronous>, transform_indices = @transform_3, window_bounds = array<i64: 128, 128>}, {pipeline_mode = #tpu.pipeline_mode<synchronous>, transform_indices = @transform_4, window_bounds = array<i64: 1, 128>}, {pipeline_mode = #tpu.pipeline_mode<synchronous>, transform_indices = @transform_5, window_bounds = array<i64: 128, 128>}, {pipeline_mode = #tpu.pipeline_mode<synchronous>, transform_indices = @transform_6, window_bounds = array<i64: 1, 128>}, {transform_indices = @transform_7, window_bounds = array<i64: 8, 128>}]} {
    %c0 = arith.constant 0 : index
    %c0_0 = arith.constant 0 : index
    %0 = vector.load %arg1[%c0, %c0_0] : memref<8x128xbf16, #tpu.memory_space<vmem>>, vector<8x128xbf16>
    %c0_1 = arith.constant 0 : index
    %c0_2 = arith.constant 0 : index
    %1 = vector.load %arg2[%c0_1, %c0_2] : memref<128x128xbf16, #tpu.memory_space<vmem>>, vector<128x128xbf16>
    %cst = arith.constant dense<0.000000e+00> : vector<8x128xf32>
    %2 = tpu.matmul %0, %1, %cst {dimension_numbers = #tpu.dot_dimension_numbers<[1], [0], [0], [1], [0, 0, 1, 1], [], []>} : vector<8x128xbf16>, vector<128x128xbf16>, vector<8x128xf32> -> vector<8x128xf32>
    %c0_3 = arith.constant 0 : index
    %c0_4 = arith.constant 0 : index
    %3 = vector.load %arg3[%c0_3, %c0_4] : memref<1x128xf32, #tpu.memory_space<vmem>>, vector<1x128xf32>
    %4 = vector.broadcast %3 : vector<1x128xf32> to vector<8x128xf32>
    %5 = arith.addf %2, %4 : vector<8x128xf32>
    %6 = math.tanh %5 : vector<8x128xf32>
    %7 = arith.truncf %6 : vector<8x128xf32> to vector<8x128xbf16>
    %c0_5 = arith.constant 0 : index
    %c0_6 = arith.constant 0 : index
    %8 = vector.load %arg4[%c0_5, %c0_6] : memref<128x128xbf16, #tpu.memory_space<vmem>>, vector<128x128xbf16>
    %cst_7 = arith.constant dense<0.000000e+00> : vector<8x128xf32>
    %9 = tpu.matmul %7, %8, %cst_7 {dimension_numbers = #tpu.dot_dimension_numbers<[1], [0], [0], [1], [0, 0, 1, 1], [], []>} : vector<8x128xbf16>, vector<128x128xbf16>, vector<8x128xf32> -> vector<8x128xf32>
    %c0_8 = arith.constant 0 : index
    %c0_9 = arith.constant 0 : index
    %10 = vector.load %arg5[%c0_8, %c0_9] : memref<1x128xf32, #tpu.memory_space<vmem>>, vector<1x128xf32>
    %11 = vector.broadcast %10 : vector<1x128xf32> to vector<8x128xf32>
    %12 = arith.addf %9, %11 : vector<8x128xf32>
    %13 = math.tanh %12 : vector<8x128xf32>
    %14 = arith.truncf %13 : vector<8x128xf32> to vector<8x128xbf16>
    %c0_10 = arith.constant 0 : index
    %c0_11 = arith.constant 0 : index
    %15 = vector.load %arg6[%c0_10, %c0_11] : memref<128x128xbf16, #tpu.memory_space<vmem>>, vector<128x128xbf16>
    %cst_12 = arith.constant dense<0.000000e+00> : vector<8x128xf32>
    %16 = tpu.matmul %14, %15, %cst_12 {dimension_numbers = #tpu.dot_dimension_numbers<[1], [0], [0], [1], [0, 0, 1, 1], [], []>} : vector<8x128xbf16>, vector<128x128xbf16>, vector<8x128xf32> -> vector<8x128xf32>
    %c0_13 = arith.constant 0 : index
    %c0_14 = arith.constant 0 : index
    %17 = vector.load %arg7[%c0_13, %c0_14] : memref<1x128xf32, #tpu.memory_space<vmem>>, vector<1x128xf32>
    %18 = vector.broadcast %17 : vector<1x128xf32> to vector<8x128xf32>
    %19 = arith.addf %16, %18 : vector<8x128xf32>
    %c0_15 = arith.constant 0 : index
    %c0_16 = arith.constant 0 : index
    %20 = vector.load %arg8[%c0_15, %c0_16] : memref<8x128xf32, #tpu.memory_space<vmem>>, vector<8x128xf32>
    tpu.vector_store %arg8[%c0_15, %c0_16], %19 {strides = array<i32>} : memref<8x128xf32, #tpu.memory_space<vmem>>, vector<8x128xf32>,
    return
  }
  func.func @transform_0(%arg0: i32) -> (i32, i32) {
    %c0_i32 = arith.constant 0 : i32
    %c0_i32_0 = arith.constant 0 : i32
    return %arg0, %c0_i32 : i32, i32
  }
  func.func @transform_1(%arg0: i32) -> (i32, i32) {
    %c0_i32 = arith.constant 0 : i32
    %c0_i32_0 = arith.constant 0 : i32
    %c0_i32_1 = arith.constant 0 : i32
    return %c0_i32, %c0_i32_0 : i32, i32
  }
  func.func @transform_2(%arg0: i32) -> (i32, i32) {
    %c0_i32 = arith.constant 0 : i32
    %c0_i32_0 = arith.constant 0 : i32
    %c0_i32_1 = arith.constant 0 : i32
    return %c0_i32, %c0_i32_0 : i32, i32
  }
  func.func @transform_3(%arg0: i32) -> (i32, i32) {
    %c0_i32 = arith.constant 0 : i32
    %c0_i32_0 = arith.constant 0 : i32
    %c0_i32_1 = arith.constant 0 : i32
    return %c0_i32, %c0_i32_0 : i32, i32
  }
  func.func @transform_4(%arg0: i32) -> (i32, i32) {
    %c0_i32 = arith.constant 0 : i32
    %c0_i32_0 = arith.constant 0 : i32
    %c0_i32_1 = arith.constant 0 : i32
    return %c0_i32, %c0_i32_0 : i32, i32
  }
  func.func @transform_5(%arg0: i32) -> (i32, i32) {
    %c0_i32 = arith.constant 0 : i32
    %c0_i32_0 = arith.constant 0 : i32
    %c0_i32_1 = arith.constant 0 : i32
    return %c0_i32, %c0_i32_0 : i32, i32
  }
  func.func @transform_6(%arg0: i32) -> (i32, i32) {
    %c0_i32 = arith.constant 0 : i32
    %c0_i32_0 = arith.constant 0 : i32
    %c0_i32_1 = arith.constant 0 : i32
    return %c0_i32, %c0_i32_0 : i32, i32
  }
  func.func @transform_7(%arg0: i32) -> (i32, i32) {
    %c0_i32 = arith.constant 0 : i32
    %c0_i32_0 = arith.constant 0 : i32
    return %arg0, %c0_i32 : i32, i32
  }
}

</mosaic_0001>

<bundles_post_ra>
// kernel: tpu_custom_call.1
= control target key start
LH: loop header
LB: loop body
LE: loop exit
PB: predicated region body
PF: predicated region fallthrough
CT: control target
= control target key end

     0   :  { %s1342_s0 = inlined_call_operand.hbm [shape: bf16[32,128], index: 0, kind: input, shape index: {}]   ;;  %s1343_s1 = inlined_call_operand.hbm [shape: bf16[128,128], index: 1, kind: input, shape index: {}]   ;;  %s1344_s2 = inlined_call_operand.vmem [shape: f32[1,128], index: 2, kind: input, shape index: {}]   ;;  %s1345_s3 = inlined_call_operand.hbm [shape: bf16[128,128], index: 3, kind: input, shape index: {}]   ;;  %s1346_s4 = inlined_call_operand.vmem [shape: f32[1,128], index: 4, kind: input, shape index: {}]   ;;  %s1347_s5 = inlined_call_operand.hbm [shape: bf16[128,128], index: 5, kind: input, shape index: {}]   ;;  %s1348_s6 = inlined_call_operand.vmem [shape: f32[1,128], index: 6, kind: input, shape index: {}]   ;;  %s1349_s7 = inlined_call_operand.hbm [shape: f32[32,128], index: 7, kind: output, shape index: {}]  }
   0x1   :  { %1350 = sst [smem:[#allocation15_spill]] %s1343_s1 }
   0x2   :  { %12 = vsyncpa [#allocation3], 0 }
   0x3   :  { %14 = vsyncpa [#allocation3 + $0x1], 0 }
   0x4   :  { %15 = vsyncpa [#allocation6], 0 }
   0x5   :  { %16 = vsyncpa [#allocation9], 0 }
   0x6   :  { %17 = vsyncpa [#allocation4], 0 }
   0x7   :  { %19 = vsyncpa [#allocation4 + $0x1], 0  ;;  %s1175_s24 = smov 0   ;;  %s1177_s25 = smov 0  }
   0x8   :  { %s1179_s26 = smov 0   ;;  %s1181_s27 = smov 0  }
   0x9 LB: > { %s1351_s1 = sld [smem:[#allocation15_spill]]  ;;  %s1199_s8 = sadd.s32 4294967295, %s1128_s27   ;;  %s1128_s27 = sphi %s1181_s27, %s1361_s27   ;;  %s1124_s26 = sphi %s1179_s26, %s1360_s26   ;;  %s1120_s25 = sphi %s1177_s25, %s1359_s25   ;;  %s1116_s24 = sphi %s1175_s24, %s1358_s24  }
   0xa   : > { %p711_p0 = scmp.ge.s32.totalorder %s1128_s27, 1  ;;  %p46_p1 = scmp.eq.s32.totalorder %s1199_s8, 0 }
   0xb   : > { %p208_p2 = scmp.lt.s32.totalorder %s1128_s27, 5  ;;  %s1130_s10 = smov [#allocation5]  }
   0xc   : > { %s221_s11 = sshll.u32 %s1130_s10, 4  ;;  %s236_s14 = sshll.u32 %s1345_s3, 4  ;;  %s222_s11 = int_to_ptr.vmem [resolvable:$true] %s221_s11  ;;  %s237_s14 = int_to_ptr.hbm [resolvable:$true] %s236_s14 }
   0xd   : > { %p1204_p3 = pnand %p711_p0, %p208_p2  ;;  %s253_s18 = sshll.u32 %s1347_s5, 4  ;;  %s254_s18 = int_to_ptr.hbm [resolvable:$true] %s253_s18 }
   0xe   : > { %s1131_s19 = smov [#allocation7]   ;;  %s1132_s21 = smov 64  }
   0xf   : > { %s219_s30 = sshll.u32 %s1351_s1, 4  ;;  %p864_p4 = pneg %p1204_p3  ;;  %s220_s30 = int_to_ptr.hbm [resolvable:$true] %s219_s30 }
  0x10   : > { %s238_s20 = sshll.u32 %s1131_s19, 4  ;;  %s1133_s22 = smov 4   ;;  %s239_s20 = int_to_ptr.vmem [resolvable:$true] %s238_s20 }
  0x11   : > { %p1215_p5 = pnand %p864_p4, %p46_p1  ;;  %s1134_s23 = smov [#allocation8]  }
  0x12   : > { %s255_s28 = sshll.u32 %s1134_s23, 4  ;;  %s710_s29 = sadd.s32 4294967294, %s1128_s27   ;;  %s256_s28 = int_to_ptr.vmem [resolvable:$true] %s255_s28 }
  0x13   : > { %867 = dma.hbm_to_vmem [thread:$0]  (!%p1215_p5), %s220_s30, 1024, %s222_s11, [#allocation6], %s1132_s21, %s1132_s21, %s1133_s22  }
  0x14   : > { %870 = dma.hbm_to_vmem [thread:$0]  (!%p1215_p5), %s237_s14, 1024, %s239_s20, [#allocation6], %s1132_s21, %s1132_s21, %s1133_s22  }
  0x15   : > { %873 = dma.hbm_to_vmem [thread:$0]  (!%p1215_p5), %s254_s18, 1024, %s256_s28, [#allocation9], %s1132_s21, %s1132_s21, %s1133_s22  }
  0x16   : > { %s1230_s10 = sadd.s32 1, %s1128_s27   ;;  %s32_s12 = sadd.s32 1, %s1124_s26 }
  0x17   : > { %s29_s30 = ssub.s32 %s1128_s27, %s1230_s10  ;;  %p39_p6 = scmp.ne.s32.totalorder %s1124_s26, %s1120_s25 }
  0x18   : > { %p30_p7 = scmp.eq.s32.totalorder %s29_s30, 0  ;;  %p40_p8 = scmp.eq.s32.totalorder %s1128_s27, 0 }
  0x19   : > { %p45_p9 = scmp.ne.s32.totalorder %s1120_s25, %s1116_s24  ;;  %p195_p10 = scmp.eq.s32.totalorder %s1199_s8, 3 }
  0x1a   : > { %s1242_s11 = scalar_select %p30_p7, %s1124_s26, %s32_s12  }
  0x1b   : > { %p1246_p11 = por %p46_p1, %p45_p9  ;;  %p1250_p12 = por %p195_p10, %p39_p6 }
  0x1c   : > { %p201_p13 = scmp.eq.s32.totalorder %s710_s29, 3  ;;  %p41_p0 = por %p40_p8, %p39_p6 }
  0x1d   : > { %s272_s15 = sand.u32 1, %s1124_s26   ;;  %p885_p4 = scmp.lt.s32.totalorder %s1128_s27, 4 }
  0x1e   : > { %p1255_p2 = por %p201_p13, %p45_p9  ;;  %s716_s17 = sshll.u32 %s272_s15, 2 }
  0x1f   : > { %s717_s18 = sshll.u32 %s1128_s27, 2  ;;  %s276_s23 = scalar_lea.vmem [#allocation2], %s716_s17 }
  0x20   : > { %s280_s21 = scalar_lea.hbm %s1342_s0, %s717_s18  ;;  %s284_s28 = sshll.u32 %s276_s23, 4  ;;  %s285_s28 = int_to_ptr.vmem [resolvable:$true] %s284_s28 }
  0x21   : > { %s282_s22 = sshll.u32 %s280_s21, 4  ;;  %p1264_p5 = pnand %p885_p4, %p41_p0  ;;  %s283_s22 = int_to_ptr.hbm [resolvable:$true] %s282_s22 }
  0x22   : > { %s273_s12 = scalar_lea.sflag [#allocation3], %s272_s15  ;;  %s1024_s30 = sshra.s32 %s283_s22, 4  ;;  %s1025_s30 = int_to_ptr.hbm [resolvable:$true] %s1024_s30 }
  0x23   : > { %s1026_s1 = scalar_lea.hbm %s1025_s30, 4  ;;  %p1028_p7 = pneg %p1264_p5 }
  0x24   : > { %p1027_p6 = scmp.ne.s32.totalorder %s1025_s30, %s1026_s1  ;;  %s1031_s17 = scalar_lea.hbm %s1342_s0, 16 }
  0x25   : > { %p1032_p10 = scmp.lt.s32.totalorder %s1025_s30, %s1342_s0  ;;  %p1033_p13 = scmp.lt.s32.totalorder %s1031_s17, %s1026_s1 }
  0x26   : > { %p1029_p8 = pnand %p1028_p7, %p1027_p6 }
  0x27   : > { %p1034_p0 = por %p1033_p13, %p1032_p10 }
  0x28   : > { %p1030_p9 = pneg %p1029_p8 }
  0x2a   : > { %p1035_p4 = pnand %p1034_p0, %p1030_p9 }
  0x2c   : > { %1038 = shalt.err (!%p1035_p4)
}
  0x2d   : > { %877 = dma.hbm_to_vmem [thread:$0]  (!%p1264_p5), %s283_s22, 64, %s285_s28, %s273_s12  }
  0x2e   : > { %293 = sbr.rel (%p1204_p3) target bundleno = 502 (0x1f6), region = 48  ;;  %s1281_s15 = sand.u32 (!%p1204_p3), 1, %s1120_s25  }
  0x2f   : > { %s719_s23 = sshll.u32 (!%p1204_p3), %s1281_s15, 2  ;;  %s296_s18 = scalar_lea.sflag (!%p1204_p3), [#allocation3], %s1281_s15 }
  0x30   : > { %s1285_s19 = scalar_lea.vmem (!%p1204_p3), [#allocation2], %s719_s23 }
  0x33   : > { %1099 = dma.done.wait (%p1246_p11), %s296_s18, 64  }
  0x34   : > { %1101 = vsyncadd (%p1246_p11), %s296_s18, 4294967232 }
  0x35   : > { %1103 = dma.done.wait (%p46_p1), [#allocation6], 2048  }
  0x36   : > { %1105 = vsyncadd (%p46_p1), [#allocation6], 4294965248 }
  0x37   : > { %1107 = dma.done.wait (%p46_p1), [#allocation9], 1024  }
  0x38   : > { %1109 = vsyncadd (%p46_p1), [#allocation9], 4294966272  ;;  %v831_v0 = vld [vmem:[#allocation5 + $0x38] sm:$0xff]  ;;  %v830_v1 = vld [vmem:[#allocation5 + $0x30] sm:$0xff]  ;;  %s821_s28 = sshll.u32 %s1199_s8, 3  ;;  %s723_s29 = sshll.u32 %s1281_s15, 3 }
  0x39   : > { %415 = vmatpush.bf16.msra.mxu0 %v831_v0  ;;  %v839_v2 = vld [vmem:[#allocation7 + $0x38] sm:$0xff]  ;;  %v838_v3 = vld [vmem:[#allocation7 + $0x30] sm:$0xff]  ;;  %v829_v4 = vld [vmem:[#allocation5 + $0x28] sm:$0xff]  ;;  %s606_s17 = scalar_lea.hbm %s1349_s7, %s821_s28  ;;  %s345_s23 = scalar_lea.vmem [#allocation10], %s723_s29 }
  0x3a   : > { %498 = vmatpush.bf16.msra.mxu1 %v839_v2  ;;  %v837_v5 = vld [vmem:[#allocation7 + $0x28] sm:$0xff]  ;;  %v828_v6 = vld [vmem:[#allocation5 + $0x20] sm:$0xff]  ;;  %v827_v8 = vld [vmem:[#allocation5 + $0x18] sm:$0xff]  ;;  %s608_s18 = sshll.u32 %s345_s23, 4  ;;  %s596_s1 = scalar_lea.sflag [#allocation4], %s1281_s15  ;;  %s609_s18 = int_to_ptr.vmem [resolvable:$true] %s608_s18 }
  0x3b   : > { %v836_v7 = vld [vmem:[#allocation7 + $0x20] sm:$0xff]  ;;  %v835_v9 = vld [vmem:[#allocation7 + $0x18] sm:$0xff]  ;;  %v826_v10 = vld [vmem:[#allocation5 + $0x10] sm:$0xff]  ;;  %s1074_s28 = scalar_lea.hbm %s1349_s7, 32 }
  0x3c   : > { %v825_v11 = vld [vmem:[#allocation5 + $0x8] sm:$0xff]  ;;  %v824_v12 = vld [vmem:[#allocation5] sm:$0xff]  ;;  %v346_v13 = vld [vmem:[%s1285_s19] sm:$0xf]  ;;  %s610_s19 = sshll.u32 %s606_s17, 4  ;;  %s611_s19 = int_to_ptr.hbm [resolvable:$true] %s610_s19 }
  0x3d   : > { %416 = vmatpush.bf16.msra.mxu0 %v830_v1  ;;  %v834_v14 = vld [vmem:[#allocation7 + $0x10] sm:$0xff]  ;;  %v833_v15 = vld [vmem:[#allocation7 + $0x8] sm:$0xff]  ;;  %v832_v16 = vld [vmem:[#allocation7] sm:$0xff]  ;;  %s1068_s8 = sshra.s32 %s611_s19, 4  ;;  %s1069_s8 = int_to_ptr.hbm [resolvable:$true] %s1068_s8 }
  0x3e   : > { %499 = vmatpush.bf16.msra.mxu1 %v838_v3  ;;  %v847_v17 = vld [vmem:[#allocation8 + $0x38] sm:$0xff]  ;;  %v846_v18 = vld [vmem:[#allocation8 + $0x30] sm:$0xff]  ;;  %v845_v19 = vld [vmem:[#allocation8 + $0x28] sm:$0xff]  ;;  %s1070_s9 = scalar_lea.hbm %s1069_s8, 8  ;;  %p1075_p5 = scmp.lt.s32.totalorder %s1069_s8, %s1349_s7 }
  0x3f   : > { %581 = vmatpush.bf16.msra.mxu2 %v847_v17  ;;  %v844_v20 = vld [vmem:[#allocation8 + $0x20] sm:$0xff]  ;;  %v843_v21 = vld [vmem:[#allocation8 + $0x18] sm:$0xff]  ;;  %v842_v28 = vld [vmem:[#allocation8 + $0x10] sm:$0xff]  ;;  %p1071_p1 = scmp.ne.s32.totalorder %s1069_s8, %s1070_s9  ;;  %p1076_p6 = scmp.lt.s32.totalorder %s1074_s28, %s1070_s9 }
  0x40   : > { %v927_v22 = vld [vmem:[%s1344_s2] ss:$0 sm:$0xff]  ;;  %v841_v29 = vld [vmem:[#allocation8 + $0x8] sm:$0xff]  ;;  %v840_v30 = vld [vmem:[#allocation8] sm:$0xff] }
  0x41   : > { %417 = vmatpush.bf16.msra.mxu0 %v829_v4  ;;  %v928_v31 = vld [vmem:[%s1346_s4] ss:$0 sm:$0xff]  ;;  %p1072_p3 = pnand %p1071_p1, %p1250_p12  ;;  %p1077_p7 = por %p1076_p6, %p1075_p5 }
  0x42   : > { %500 = vmatpush.bf16.msra.mxu1 %v837_v5  ;;  %v929_v37 = vld [vmem:[%s1348_s6] ss:$0 sm:$0xff] }
  0x43   : > { %582 = vmatpush.bf16.msra.mxu2 %v846_v18  ;;  %p1073_p11 = pneg %p1072_p3 }
  0x45   : > { %418 = vmatpush.bf16.msra.mxu0 %v828_v6  ;;  %p1078_p8 = pnand %p1077_p7, %p1073_p11 }
  0x46   : > { %501 = vmatpush.bf16.msra.mxu1 %v836_v7 }
  0x47   : > { %583 = vmatpush.bf16.msra.mxu2 %v845_v19 }
  0x49   : > { %419 = vmatpush.bf16.msra.mxu0 %v827_v8 }
  0x4a   : > { %502 = vmatpush.bf16.msra.mxu1 %v835_v9 }
  0x4b   : > { %584 = vmatpush.bf16.msra.mxu2 %v844_v20 }
  0x4d   : > { %420 = vmatpush.bf16.msra.mxu0 %v826_v10 }
  0x4e   : > { %503 = vmatpush.bf16.msra.mxu1 %v834_v14 }
  0x4f   : > { %585 = vmatpush.bf16.msra.mxu2 %v843_v21 }
  0x51   : > { %421 = vmatpush.bf16.msra.mxu0 %v825_v11 }
  0x52   : > { %504 = vmatpush.bf16.msra.mxu1 %v833_v15 }
  0x53   : > { %586 = vmatpush.bf16.msra.mxu2 %v842_v28 }
  0x55   : > { %422 = vmatpush.bf16.msra.mxu0 %v824_v12 }
  0x56   : > { %505 = vmatpush.bf16.msra.mxu1 %v832_v16 }
  0x57   : > { %587 = vmatpush.bf16.msra.mxu2 %v841_v29 }
  0x58   : > { %423 = vmatmul.bf16.vlgmr.msra.gmra.mxu0 %v346_v13 }
  0x5b   : > { %588 = vmatpush.bf16.msra.mxu2 %v840_v30 }
  0xd5   : > { %v424_v23 = vpop.f32.mrf.mxu0 }
  0xd6   : > { %v425_v24 = vadd.f32 %v927_v22, %v424_v23 }
  0xd8   : > { %930 = vtanh.f32 %v425_v24 }
  0xdd   : > { %v426_v25 = vpop.f32.mrf.mxu0 }
  0xde   : > { %v931_v26 = vpop.eup %930 }
  0xdf   : > { %v429_v27 = vpack.c.bf16 %v931_v26, %v931_v26 }
  0xe1   : > { %506 = vmatmul.bf16.vlgmr.msra.gmra.mxu1 %v429_v27 }
 0x15e   : > { %v507_v32 = vpop.f32.mrf.mxu1 }
 0x15f   : > { %v508_v33 = vadd.f32 %v928_v31, %v507_v32 }
 0x161   : > { %932 = vtanh.f32 %v508_v33 }
 0x166   : > { %v509_v34 = vpop.f32.mrf.mxu1 }
 0x167   : > { %v933_v35 = vpop.eup %932 }
 0x168   : > { %v512_v36 = vpack.c.bf16 %v933_v35, %v933_v35 }
 0x16a   : > { %589 = vmatmul.bf16.vlgmr.msra.gmra.mxu2 %v512_v36 }
 0x1ed   : > { %v590_v38 = vpop.f32.mrf.mxu2 }
 0x1ee   : > { %v591_v39 = vadd.f32 %v929_v37, %v590_v38 }
 0x1f0   : > { %594 = vst [vmem:[%s345_s23] sm:$0xff] %v591_v39 }
 0x1f1   : > { %1081 = shalt.err (!%p1078_p8)
}
 0x1f2   : > { %862 = dma.vmem_to_hbm [thread:$0]  (%p1250_p12), %s609_s18, 128, %s611_s19, %s596_s1  }
 0x1f5   : > { %v592_v40 = vpop.f32.mrf.mxu2 }
 0x1f6 PF: > { %p889_p9 = scmp.ge.s32.totalorder %s1128_s27, 2  ;;  %s622_s15 = sand.u32 1, %s1116_s24  }
 0x1f7   : > { %s623_s30 = scalar_lea.sflag [#allocation4], %s622_s15 }
 0x1f8   : > { %p879_p10 = pnand %p889_p9, %p1255_p2 }
 0x1fa   : > { %p880_p13 = pneg %p879_p10 }
 0x1fc   : > { %1111 = dma.done.wait (%p880_p13), %s623_s30, 128  }
 0x1fd   : > { %1113 = vsyncadd (%p880_p13), %s623_s30, 4294967168  ;;  %p22_p0 = scmp.ge.s32.totalorder %s1230_s10, 6   ;;  %s1358_s24 = smov %s1120_s25 }
 0x1fe   : > { %s1359_s25 = smov %s1124_s26  ;;  %s1360_s26 = smov %s1242_s11 }
 0x1ff   : > { %s1361_s27 = smov %s1230_s10  ;;  %24 = sbr.rel (!%p22_p0) target bundleno = 9 (0x9), region = 105 }
 0x204   :  { %629 = vsyncpa [#allocation3], 1 }
 0x205   :  { %631 = vsyncpa [#allocation3 + $0x1], 1 }
 0x206   :  { %632 = vsyncpa [#allocation6], 1 }
 0x207   :  { %633 = vsyncpa [#allocation9], 1 }
 0x208   :  { %634 = vsyncpa [#allocation4], 1 }
 0x209   :  { %636 = vsyncpa [#allocation4 + $0x1], 1 }

</bundles_post_ra>
